<compile_context>
chip_gen: v5e
topology: v5e:2x2
jax: 0.10.0
libtpu: 0.0.40
codegen_flags: <defaults>
</compile_context>

<pallas_src>
import functools

import jax
import jax.numpy as jnp
from jax.experimental import pallas as pl
from jax.experimental.pallas import tpu as pltpu

EXPANSION = 1                       # block.expansion
MAX_TM = 512                        # max rows tile (multiple of 16 for bf16)
MAX_TK = 2048                       # fallback reduce tile (multiple of 128)
FULL_K_VMEM_BUDGET = 20 * 1024 * 1024   # collapse K axis if footprint fits this
GEMM_VMEM_LIMIT = 32 * 1024 * 1024      # explicit scoped-VMEM request (safe on v5e/v6e/v7x)


# ------------------------------ tile selection -------------------------------

def _round_up(x, m):
    return (x + m - 1) // m * m


def _select_tiles(m, kp, np_, has_residual, out_bytes):
    """Return (padded M, TM, TN, TK) for a (m x kp) @ (kp x np_) GEMM."""
    mp = _round_up(m, 16)
    if mp <= MAX_TM:
        tm = mp
    else:
        tm = MAX_TM
        mp = _round_up(m, MAX_TM)

    tn = 256 if (np_ % 256 == 0) else 128
    tn = min(tn, np_)
    # v7x has 2 TensorCores: make sure the parallel grid has >=2 blocks if we can.
    if (mp // tm) * (np_ // tn) < 2 and (np_ // 128) >= 2:
        tn = 128

    def footprint(tk):
        f = 2 * tm * tk * 2 + 2 * tk * tn * 2          # double-buffered A, B (bf16)
        f += tm * tn * 4 + 2 * tm * tn * out_bytes     # acc scratch + out buffers
        f += 2 * tn * 4                                # bias
        if has_residual:
            f += 2 * tm * tn * 2
        return f

    if footprint(kp) <= FULL_K_VMEM_BUDGET:
        tk = kp                                        # single K step per output tile
    else:
        nblk, cap, best = kp // 128, MAX_TK // 128, 1
        for d in range(1, min(nblk, cap) + 1):
            if nblk % d == 0:
                best = d
        tk = best * 128
    return mp, tm, tn, tk


# ------------------------------- Pallas kernels -------------------------------

def _mm_bias_act_kernel(*refs, relu, has_residual, single_k):
    """out = maybe_relu((a @ b) + bias [+ residual]); optional K-axis accumulation."""
    if has_residual:
        a_ref, b_ref, bias_ref, r_ref = refs[:4]
        rest = refs[4:]
    else:
        a_ref, b_ref, bias_ref = refs[:3]
        r_ref = None
        rest = refs[3:]

    if single_k:
        (o_ref,) = rest
        y = jnp.dot(a_ref[...], b_ref[...], preferred_element_type=jnp.float32)
        y = y + bias_ref[...]
        if has_residual:
            y = y + r_ref[...].astype(jnp.float32)
        if relu:
            y = jnp.maximum(y, 0.0)
        o_ref[...] = y.astype(o_ref.dtype)
        return

    o_ref, acc_ref = rest
    k = pl.program_id(2)

    @pl.when(k == 0)
    def _():
        acc_ref[...] = jnp.zeros_like(acc_ref)

    acc_ref[...] += jnp.dot(a_ref[...], b_ref[...],
                            preferred_element_type=jnp.float32)

    @pl.when(k == pl.num_programs(2) - 1)
    def _():
        y = acc_ref[...] + bias_ref[...]
        if has_residual:
            y = y + r_ref[...].astype(jnp.float32)
        if relu:
            y = jnp.maximum(y, 0.0)
        o_ref[...] = y.astype(o_ref.dtype)


def _gap_kernel(x_ref, o_ref, *, inv_s):
    """Global average pool: accumulate partial sums over the spatial grid axis."""
    s = pl.program_id(1)

    @pl.when(s == 0)
    def _():
        o_ref[...] = jnp.zeros_like(o_ref)

    o_ref[...] += jnp.sum(x_ref[...].astype(jnp.float32), axis=1, keepdims=True)

    @pl.when(s == pl.num_programs(1) - 1)
    def _():
        o_ref[...] = o_ref[...] * inv_s


# ------------------------------ kernel wrappers -------------------------------

def matmul_bias_act(a, b_pad, bias_pad, *, residual=None, relu=False,
                    out_dtype=jnp.bfloat16, n_true=None):
    """a:(M,Kp) float, b_pad:(Kp,Np) bf16, bias_pad:(1,Np) f32.
    Returns (M, Np) (or (M, n_true) if n_true given).  residual: (M, Np)."""
    m, k = a.shape
    kp, np_ = b_pad.shape
    assert k == kp, (k, kp)
    out_bytes = jnp.dtype(out_dtype).itemsize
    mp, tm, tn, tk = _select_tiles(m, kp, np_, residual is not None, out_bytes)

    a = a.astype(jnp.bfloat16)
    if mp > m:
        a = jnp.pad(a, ((0, mp - m), (0, 0)))

    operands = [a, b_pad, bias_pad]
    in_specs = [
        pl.BlockSpec((tm, tk), lambda i, j, kk: (i, kk)),
        pl.BlockSpec((tk, tn), lambda i, j, kk: (kk, j)),
        pl.BlockSpec((1, tn), lambda i, j, kk: (0, j)),
    ]
    if residual is not None:
        r = residual.astype(jnp.bfloat16)
        assert r.shape[1] == np_, (r.shape, np_)
        if r.shape[0] < mp:
            r = jnp.pad(r, ((0, mp - r.shape[0]), (0, 0)))
        operands.append(r)
        in_specs.append(pl.BlockSpec((tm, tn), lambda i, j, kk: (i, j)))

    n_k = kp // tk
    grid = (mp // tm, np_ // tn, n_k)
    scratch = [] if n_k == 1 else [pltpu.VMEM((tm, tn), jnp.float32)]

    bytes_accessed = (mp * kp * 2 + kp * np_ * 2 + mp * np_ * out_bytes + np_ * 4
                      + (mp * np_ * 2 if residual is not None else 0))
    cost = pl.CostEstimate(flops=2 * mp * kp * np_, transcendentals=0,
                           bytes_accessed=int(bytes_accessed))

    out = pl.pallas_call(
        functools.partial(_mm_bias_act_kernel, relu=relu,
                          has_residual=residual is not None,
                          single_k=(n_k == 1)),
        out_shape=jax.ShapeDtypeStruct((mp, np_), out_dtype),
        grid_spec=pltpu.PrefetchScalarGridSpec(
            num_scalar_prefetch=0,
            grid=grid,
            in_specs=in_specs,
            out_specs=pl.BlockSpec((tm, tn), lambda i, j, kk: (i, j)),
            scratch_shapes=scratch,
        ),
        compiler_params=pltpu.CompilerParams(
            dimension_semantics=("parallel", "parallel", "arbitrary"),
            vmem_limit_bytes=GEMM_VMEM_LIMIT),
        cost_estimate=cost,
    )(*operands)

    if mp > m:
        out = out[:m]
    if n_true is not None and n_true < np_:
        out = out[:, :n_true]
    return out


def global_avg_pool(x):
    """x: (B, S, C) -> (B, C) f32 (mean over the spatial axis)."""
    b, s, c = x.shape
    sp = _round_up(s, 16)
    if sp > 4096:
        ts = 2048
        sp = _round_up(s, ts)
    else:
        ts = sp
    if sp > s:
        x = jnp.pad(x, ((0, 0), (0, sp - s), (0, 0)))   # zeros don't change sum
    grid = (b, sp // ts)
    cost = pl.CostEstimate(
        flops=b * sp * c, transcendentals=0,
        bytes_accessed=int(b * sp * c * x.dtype.itemsize + b * c * 4))
    out = pl.pallas_call(
        functools.partial(_gap_kernel, inv_s=1.0 / s),
        out_shape=jax.ShapeDtypeStruct((b, 1, c), jnp.float32),
        grid_spec=pltpu.PrefetchScalarGridSpec(
            num_scalar_prefetch=0,
            grid=grid,
            in_specs=[pl.BlockSpec((1, ts, c), lambda bi, si: (bi, si, 0))],
            out_specs=pl.BlockSpec((1, 1, c), lambda bi, si: (bi, 0, 0)),
        ),
        compiler_params=pltpu.CompilerParams(
            dimension_semantics=("parallel", "arbitrary")),
        cost_estimate=cost,
    )(x)
    return out.reshape(b, c)


# ---------------------------- conv glue (im2col) ------------------------------

def im2col3d(x, ksize, stride, pad, c_true, k_padded):
    """x:(N,D,H,W,Cpad) -> (N*Do*Ho*Wo, k_padded) bf16, tap order (kd,kh,kw,C).
    Only the true channels are gathered; the K tail is zero-filled in the same
    concatenate (no extra pad pass)."""
    n, d, h, w, _ = x.shape
    x = x[..., :c_true].astype(jnp.bfloat16)
    kd, kh, kw = ksize
    sd, sh, sw = stride
    pd, ph, pw = pad
    xp = jnp.pad(x, ((0, 0), (pd, pd), (ph, ph), (pw, pw), (0, 0)))
    do = (d + 2 * pd - kd) // sd + 1
    ho = (h + 2 * ph - kh) // sh + 1
    wo = (w + 2 * pw - kw) // sw + 1
    cols = []
    for i in range(kd):
        for j in range(kh):
            for k in range(kw):
                cols.append(xp[:,
                               i:i + (do - 1) * sd + 1:sd,
                               j:j + (ho - 1) * sh + 1:sh,
                               k:k + (wo - 1) * sw + 1:sw, :])
    k_true = kd * kh * kw * c_true
    if k_padded > k_true:
        cols.append(jnp.zeros((n, do, ho, wo, k_padded - k_true), jnp.bfloat16))
    col = jnp.concatenate(cols, axis=-1)
    return col.reshape(n * do * ho * wo, k_padded), (do, ho, wo)


def conv3d_bn(x, cp, stride, pad, relu, residual=None):
    """x:(N,D,H,W,Cin_padded) bf16; cp: prepared conv dict (BN folded, padded bf16 W).
    Returns (N,Do,Ho,Wo,Cout_padded) bf16 with padded lanes guaranteed zero."""
    n = x.shape[0]
    col, (do, ho, wo) = im2col3d(x, cp["ksize"], stride, pad,
                                 cp["cin"], cp["w"].shape[0])
    m = n * do * ho * wo
    r = residual.reshape(m, residual.shape[-1]) if residual is not None else None
    out = matmul_bias_act(col, cp["w"], cp["b"], residual=r, relu=relu,
                          out_dtype=jnp.bfloat16)
    return out.reshape(n, do, ho, wo, out.shape[-1])


# -------------------------------- parameters ----------------------------------

def _conv_w(key, cout, cin, k):
    fan_out = cout * k[0] * k[1] * k[2]
    std = (2.0 / fan_out) ** 0.5
    return std * jax.random.normal(key, (cout, cin, *k), jnp.float32)


def _bn_params(key, c, eps=1e-5):
    k1, k2, k3, k4 = jax.random.split(key, 4)
    gamma = 1.0 + 0.1 * jax.random.normal(k1, (c,), jnp.float32)
    beta = 0.1 * jax.random.normal(k2, (c,), jnp.float32)
    mean = 0.1 * jax.random.normal(k3, (c,), jnp.float32)
    var = 1.0 + 0.1 * jnp.abs(jax.random.normal(k4, (c,), jnp.float32))
    scale = gamma / jnp.sqrt(var + eps)
    bias = beta - mean * scale
    return scale, bias


def _prep_conv(w, bn):
    """Fold BN scale into the GEMM weight, pad to tile-aligned (Kp,Np), cast bf16."""
    scale, bias = bn
    cout, cin, kd, kh, kw = w.shape
    k = kd * kh * kw * cin
    wmat = jnp.transpose(w, (2, 3, 4, 1, 0)).reshape(k, cout) * scale[None, :]
    kp = _round_up(k, 128)
    np_ = _round_up(cout, 128)
    wmat = jnp.pad(wmat, ((0, kp - k), (0, np_ - cout))).astype(jnp.bfloat16)
    b = jnp.pad(bias, (0, np_ - cout)).astype(jnp.float32).reshape(1, np_)
    return {"w": wmat, "b": b, "cout": cout, "cin": cin, "ksize": (kd, kh, kw)}


def make_basic_block_params(key, inplanes, planes, stride, need_downsample):
    keys = jax.random.split(key, 6)
    p = {
        "conv1": _prep_conv(_conv_w(keys[0], planes, inplanes, (3, 3, 3)),
                            _bn_params(keys[1], planes)),
        "conv2": _prep_conv(_conv_w(keys[2], planes, planes, (3, 3, 3)),
                            _bn_params(keys[3], planes)),
        "stride": stride,
        "downsample": None,
    }
    if need_downsample:
        p["downsample"] = _prep_conv(
            _conv_w(keys[4], planes * EXPANSION, inplanes, (1, 1, 1)),
            _bn_params(keys[5], planes * EXPANSION))
    return p


def make_resnest_params(key, layers=(1, 1, 1, 1), num_classes=3, input_channels=1):
    keys = jax.random.split(key, 8)
    params = {
        "stem": _prep_conv(_conv_w(keys[0], 64, input_channels, (3, 3, 3)),
                           _bn_params(keys[1], 64)),
    }
    inplanes = 64

    def make_layer(lkey, inplanes, planes, blocks, stride):
        bkeys = jax.random.split(lkey, blocks)
        need_ds = (stride != 1) or (inplanes != planes * EXPANSION)
        blist = [make_basic_block_params(bkeys[0], inplanes, planes, stride, need_ds)]
        inplanes = planes * EXPANSION
        for i in range(1, blocks):
            blist.append(make_basic_block_params(bkeys[i], inplanes, planes, 1, False))
        return blist, inplanes

    params["layer1"], inplanes = make_layer(keys[2], inplanes, 64, layers[0], 1)
    params["layer2"], inplanes = make_layer(keys[3], inplanes, 128, layers[1], 2)
    params["layer3"], inplanes = make_layer(keys[4], inplanes, 256, layers[2], 2)
    params["layer4"], inplanes = make_layer(keys[5], inplanes, 512, layers[3], 2)

    # fc (Linear): logits = pooled @ fc_w.T + fc_b, pre-padded / bf16 like convs.
    fc_w = 0.01 * jax.random.normal(keys[6], (num_classes, 512 * EXPANSION),
                                    jnp.float32)
    fc_b = jnp.zeros((num_classes,), jnp.float32)
    k = 512 * EXPANSION
    kp = _round_up(k, 128)
    np_ = _round_up(num_classes, 128)
    params["fc"] = {
        "w": jnp.pad(fc_w.T, ((0, kp - k), (0, np_ - num_classes))).astype(jnp.bfloat16),
        "b": jnp.pad(fc_b, (0, np_ - num_classes)).astype(jnp.float32).reshape(1, np_),
        "n": num_classes,
    }
    return params


# ---------------------------------- forward -----------------------------------

def basic_block_forward(p, x):
    s = p["stride"]
    out = conv3d_bn(x, p["conv1"], (s, s, s), (1, 1, 1), relu=True)
    if p["downsample"] is not None:
        identity = conv3d_bn(x, p["downsample"], (s, s, s), (0, 0, 0), relu=False)
    else:
        identity = x
    # conv2 + BN + residual add + ReLU fused into a single GEMM epilogue.
    return conv3d_bn(out, p["conv2"], (1, 1, 1), (1, 1, 1), relu=True,
                     residual=identity)


def resnest_forward(params, x_ncdhw):
    x = jnp.transpose(x_ncdhw, (0, 2, 3, 4, 1)).astype(jnp.bfloat16)  # NCDHW->NDHWC
    # stem: conv 3x3x3 stride (1,2,2) + BN + ReLU
    x = conv3d_bn(x, params["stem"], (1, 2, 2), (1, 1, 1), relu=True)
    for layer in ("layer1", "layer2", "layer3", "layer4"):
        for blk in params[layer]:
            x = basic_block_forward(blk, x)
    n, d, h, w, c = x.shape                                       # c == 512 here
    pooled = global_avg_pool(x.reshape(n, d * h * w, c))          # (N, C) f32
    fc = params["fc"]
    logits = matmul_bias_act(pooled, fc["w"], fc["b"], relu=False,
                             out_dtype=jnp.float32, n_true=fc["n"])
    return logits


# ------------------------------------ main -------------------------------------

if __name__ == "__main__":
    key = jax.random.PRNGKey(0)
    pkey, xkey = jax.random.split(key)
    params = make_resnest_params(pkey, layers=(1, 1, 1, 1),
                                 num_classes=3, input_channels=1)
    # PyTorch-style NCDHW input: batch=2, channels=1, D=8, H=16, W=16
    x = jax.random.normal(xkey, (2, 1, 8, 16, 16), jnp.float32)
    out = resnest_forward(params, x)
    out = jax.block_until_ready(out)
    assert out.shape == (2, 3) and out.dtype == jnp.float32
    print("KERNEL_OK")
</pallas_src>

<mosaic_0001>
module attributes {stable_mosaic.version = 11 : i64} {
  func.func @_mm_bias_act_kernel(%arg0: i32, %arg1: i32, %arg2: i32, %arg3: memref<512x128xbf16, #tpu.memory_space<vmem>>, %arg4: memref<128x128xbf16, #tpu.memory_space<vmem>>, %arg5: memref<1x128xf32, #tpu.memory_space<vmem>>, %arg6: memref<512x128xbf16, #tpu.memory_space<vmem>>) attributes {dimension_semantics = [#tpu.dimension_semantics<parallel>, #tpu.dimension_semantics<parallel>, #tpu.dimension_semantics<arbitrary>], iteration_bounds = array<i64: 2, 1, 1>, scalar_prefetch = 0 : i64, scratch_operands = 0 : i64, tpu.core_type = #tpu.core_type<tc>, window_params = [{transform_indices = @transform_0, window_bounds = array<i64: 512, 128>}, {transform_indices = @transform_1, window_bounds = array<i64: 128, 128>}, {transform_indices = @transform_2, window_bounds = array<i64: 1, 128>}, {transform_indices = @transform_3, window_bounds = array<i64: 512, 128>}]} {
    %c0 = arith.constant 0 : index
    %c0_0 = arith.constant 0 : index
    %0 = vector.load %arg3[%c0, %c0_0] : memref<512x128xbf16, #tpu.memory_space<vmem>>, vector<512x128xbf16>
    %c0_1 = arith.constant 0 : index
    %c0_2 = arith.constant 0 : index
    %1 = vector.load %arg4[%c0_1, %c0_2] : memref<128x128xbf16, #tpu.memory_space<vmem>>, vector<128x128xbf16>
    %cst = arith.constant dense<0.000000e+00> : vector<512x128xf32>
    %2 = tpu.matmul %0, %1, %cst {dimension_numbers = #tpu.dot_dimension_numbers<[1], [0], [0], [1], [0, 0, 1, 1], [], []>} : vector<512x128xbf16>, vector<128x128xbf16>, vector<512x128xf32> -> vector<512x128xf32>
    %c0_3 = arith.constant 0 : index
    %c0_4 = arith.constant 0 : index
    %3 = vector.load %arg5[%c0_3, %c0_4] : memref<1x128xf32, #tpu.memory_space<vmem>>, vector<1x128xf32>
    %4 = vector.broadcast %3 : vector<1x128xf32> to vector<512x128xf32>
    %5 = arith.addf %2, %4 : vector<512x128xf32>
    %cst_5 = arith.constant 0.000000e+00 : f32
    %6 = vector.broadcast %cst_5 : f32 to vector<512x128xf32>
    %7 = arith.maximumf %5, %6 : vector<512x128xf32>
    %8 = arith.truncf %7 : vector<512x128xf32> to vector<512x128xbf16>
    %c0_6 = arith.constant 0 : index
    %c0_7 = arith.constant 0 : index
    %9 = vector.load %arg6[%c0_6, %c0_7] : memref<512x128xbf16, #tpu.memory_space<vmem>>, vector<512x128xbf16>
    tpu.vector_store %arg6[%c0_6, %c0_7], %8 {strides = array<i32>} : memref<512x128xbf16, #tpu.memory_space<vmem>>, vector<512x128xbf16>,
    return
  }
  func.func @transform_0(%arg0: i32, %arg1: i32, %arg2: i32) -> (i32, i32) {
    %c0_i32 = arith.constant 0 : i32
    return %arg0, %arg2 : i32, i32
  }
  func.func @transform_1(%arg0: i32, %arg1: i32, %arg2: i32) -> (i32, i32) {
    %c0_i32 = arith.constant 0 : i32
    return %arg2, %arg1 : i32, i32
  }
  func.func @transform_2(%arg0: i32, %arg1: i32, %arg2: i32) -> (i32, i32) {
    %c0_i32 = arith.constant 0 : i32
    %c0_i32_0 = arith.constant 0 : i32
    return %c0_i32, %arg1 : i32, i32
  }
  func.func @transform_3(%arg0: i32, %arg1: i32, %arg2: i32) -> (i32, i32) {
    %c0_i32 = arith.constant 0 : i32
    return %arg0, %arg1 : i32, i32
  }
}

</mosaic_0001>

<bundles_post_ra>
// kernel: tpu_custom_call.1
= control target key start
LH: loop header
LB: loop body
LE: loop exit
PB: predicated region body
PF: predicated region fallthrough
CT: control target
= control target key end

     0   :  { %s2059_s0 = inlined_call_operand.hbm [shape: bf16[1024,128], index: 0, kind: input, shape index: {}]   ;;  %s2060_s1 = inlined_call_operand.hbm [shape: bf16[128,128], index: 1, kind: input, shape index: {}]   ;;  %s2061_s2 = inlined_call_operand.vmem [shape: f32[1,128], index: 2, kind: input, shape index: {}]   ;;  %s2062_s3 = inlined_call_operand.hbm [shape: bf16[1024,128], index: 3, kind: output, shape index: {}]  }
   0x1   :  { %2064 = sst [smem:[#allocation11_spill]] %s2060_s1 }
   0x2   :  { %8 = vsyncpa [#allocation3], 0 }
   0x3   :  { %10 = vsyncpa [#allocation3 + $0x1], 0 }
   0x4   :  { %11 = vsyncpa [#allocation6], 0 }
   0x5   :  { %12 = vsyncpa [#allocation4], 0 }
   0x6   :  { %14 = vsyncpa [#allocation4 + $0x1], 0  ;;  %s1762_s12 = smov 0   ;;  %s1764_s13 = smov 0  }
   0x7   :  { %s1766_s14 = smov 0   ;;  %s1768_s15 = smov 0  }
   0x8   :  { %s1770_s16 = smov 0   ;;  %s1772_s17 = smov 0  }
   0x9 LB: > { %s1076_s18 = sadd.s32 4294967295, %s1735_s17   ;;  %s1077_s19 = sadd.s32 4294967294, %s1735_s17   ;;  %s1735_s17 = sphi %s1772_s17, %s20_s17   ;;  %s1731_s16 = sphi %s1770_s16, %s2078_s16   ;;  %s1727_s15 = sphi %s1768_s15, %s2077_s15   ;;  %s1723_s14 = sphi %s1766_s14, %s2076_s14   ;;  %s1719_s13 = sphi %s1764_s13, %s2075_s13   ;;  %s1715_s12 = sphi %s1762_s12, %s2074_s12  }
   0xa   : > { %p61_p0 = scmp.ne.s32.totalorder %s1719_s13, %s1715_s12  ;;  %p1796_p1 = scmp.eq.s32.totalorder %s1076_s18, 0 }
   0xb   : > { %p1800_p2 = scmp.eq.s32.totalorder %s1076_s18, 1  ;;  %p147_p3 = scmp.eq.s32.totalorder %s1077_s19, 1 }
   0xc   : > { %p1806_p4 = por %p1796_p1, %p61_p0  ;;  %p1078_p5 = scmp.ge.s32.totalorder %s1735_s17, 1 }
   0xd   : > { %p1811_p6 = por %p147_p3, %p61_p0  ;;  %p154_p7 = scmp.lt.s32.totalorder %s1735_s17, 3 }
   0xe   : > { %s2069_s1 = sld [smem:[#allocation11_spill]]  ;;  %s1737_s28 = smov [#allocation5]  }
   0xf   : > { %p1819_p8 = pnand %p1078_p5, %p154_p7  ;;  %s171_s29 = sshll.u32 %s1737_s28, 4  ;;  %s172_s29 = int_to_ptr.vmem [resolvable:$true] %s171_s29 }
  0x10   : > { %p1081_p11 = scmp.ge.s32.totalorder %s1735_s17, 2  ;;  %s2063_s30 = smov 64  }
  0x11   : > { %p1519_p9 = pneg %p1819_p8  ;;  %s1739_s4 = smov 4  }
  0x12   : > { %s39_s5 = sadd.s32 1, %s1731_s16  ;;  %s48_s6 = sadd.s32 1, %s1723_s14 }
  0x13   : > { %p1520_p10 = pnand %p1519_p9, %p1796_p1  ;;  %p41_p12 = scmp.ge.s32.totalorder %s39_s5, 2 }
  0x14   : > { %s169_s26 = sshll.u32 %s2069_s1, 4  ;;  %p55_p13 = scmp.ne.s32.totalorder %s1723_s14, %s1719_s13  ;;  %s170_s26 = int_to_ptr.hbm [resolvable:$true] %s169_s26 }
  0x15   : > { %1522 = dma.hbm_to_vmem [thread:$0]  (!%p1520_p10), %s170_s26, 1024, %s172_s29, [#allocation6], %s2063_s30, %s2063_s30, %s1739_s4  }
  0x16   : > { %p56_p0 = scmp.eq.s32.totalorder %s1735_s17, 0  ;;  %s2080_s5 = smov (%p41_p12, %s39_s5), 0 }
  0x17   : > { %p1844_p5 = por %p1800_p2, %p55_p13  ;;  %s43_s9 = ssub.s32 %s1731_s16, %s2080_s5 }
  0x18   : > { %p1838_p3 = por %p56_p0, %p55_p13  ;;  %p1532_p7 = scmp.lt.s32.totalorder %s1735_s17, 2 }
  0x19   : > { %p46_p9 = scmp.eq.s32.totalorder %s43_s9, 0  ;;  %s191_s10 = sand.u32 1, %s1723_s14  }
  0x1a   : > { %s1082_s11 = sshll.u32 %s191_s10, 8  ;;  %s1254_s19 = sshll.u32 %s1731_s16, 8 }
  0x1b   : > { %s1853_s18 = scalar_select %p46_p9, %s1723_s14, %s48_s6  }
  0x1c   : > { %s201_s26 = scalar_lea.hbm %s2059_s0, %s1254_s19  ;;  %s195_s28 = scalar_lea.vmem [#allocation2], %s1082_s11 }
  0x1d   : > { %s204_s29 = sshll.u32 %s195_s28, 4  ;;  %s202_s21 = sshll.u32 %s201_s26, 4  ;;  %s205_s29 = int_to_ptr.vmem [resolvable:$true] %s204_s29  ;;  %s203_s21 = int_to_ptr.hbm [resolvable:$true] %s202_s21 }
  0x1e   : > { %p1524_p2 = pnand %p1532_p7, %p1838_p3  ;;  %s192_s30 = scalar_lea.sflag [#allocation3], %s191_s10 }
  0x1f   : > { %s2073_s1 = smov 64   ;;  %216 = sbr.rel (%p1819_p8) target bundleno = 335 (0x14f), region = 32 }
  0x20   : > { %1526 = dma.hbm_to_vmem [thread:$0]  (!%p1524_p2), %s203_s21, 4096, %s205_s29, %s192_s30, %s2073_s1, %s2073_s1, %s1739_s4  }
  0x21   : > { %s1867_s6 = sand.u32 (!%p1819_p8), 1, %s1719_s13  }
  0x22   : > { %s1086_s9 = sshll.u32 (!%p1819_p8), %s1867_s6, 8  ;;  %s219_s11 = scalar_lea.sflag (!%p1819_p8), [#allocation3], %s1867_s6 }
  0x23   : > { %s1873_s7 = scalar_lea.vmem (!%p1819_p8), [#allocation2], %s1086_s9 }
  0x24   : > { %1702 = dma.done.wait (%p1806_p4), %s219_s11, 4096  }
  0x25   : > { %1704 = vsyncadd (%p1806_p4), %s219_s11, 4294963200 }
  0x26   : > { %1706 = dma.done.wait (%p1796_p1), [#allocation6], 1024  }
  0x27   : > { %1708 = vsyncadd (%p1796_p1), [#allocation6], 4294966272  ;;  %v1294_v0 = vld [vmem:[#allocation5 + $0x38] sm:$0xff]  ;;  %v1293_v1 = vld [vmem:[#allocation5 + $0x30] sm:$0xff]  ;;  %s1928_s22 = scalar_lea.vmem [#allocation7], %s1086_s9  ;;  %s1295_s27 = sshll.u32 %s1727_s15, 8 }
  0x28   : > { %584 = vmatpush.bf16.msra.mxu0 %v1294_v0  ;;  %1487 = vmatpush.bf16.msra.mxu1 %v1294_v0  ;;  %v1292_v2 = vld [vmem:[#allocation5 + $0x28] sm:$0xff]  ;;  %v1291_v3 = vld [vmem:[#allocation5 + $0x20] sm:$0xff]  ;;  %v1290_v4 = vld [vmem:[#allocation5 + $0x18] sm:$0xff]  ;;  %s958_s10 = scalar_lea.hbm %s2062_s3, %s1295_s27  ;;  %s959_s15 = sshll.u32 %s1928_s22, 4  ;;  %s960_s15 = int_to_ptr.vmem [resolvable:$true] %s959_s15 }
  0x29   : > { %1488 = vmatpush.bf16.msra.mxu2 %v1294_v0  ;;  %1489 = vmatpush.bf16.msra.mxu3 %v1294_v0  ;;  %v1289_v5 = vld [vmem:[#allocation5 + $0x10] sm:$0xff]  ;;  %v1288_v6 = vld [vmem:[#allocation5 + $0x8] sm:$0xff]  ;;  %v1287_v7 = vld [vmem:[#allocation5] sm:$0xff]  ;;  %s961_s19 = sshll.u32 %s958_s10, 4  ;;  %s946_s24 = scalar_lea.sflag [#allocation4], %s1867_s6  ;;  %s962_s19 = int_to_ptr.hbm [resolvable:$true] %s961_s19 }
  0x2a   : > { %v1255_v8 = vld [vmem:[%s1873_s7] sm:$0xff]  ;;  %v1256_v12 = vld [vmem:[%s1873_s7 + $0x8] sm:$0xff]  ;;  %v1257_v16 = vld [vmem:[%s1873_s7 + $0x10] sm:$0xff]  ;;  %s1663_s25 = sshra.s32 %s962_s19, 4  ;;  %s1669_s21 = scalar_lea.hbm %s2062_s3, 512  ;;  %s1664_s25 = int_to_ptr.hbm [resolvable:$true] %s1663_s25 }
  0x2b   : > { %v1263_v9 = vld [vmem:[%s1873_s7 + $0x40] sm:$0xff]  ;;  %v1264_v13 = vld [vmem:[%s1873_s7 + $0x48] sm:$0xff]  ;;  %v1265_v17 = vld [vmem:[%s1873_s7 + $0x50] sm:$0xff]  ;;  %s1665_s26 = scalar_lea.hbm %s1664_s25, 256  ;;  %p1670_p10 = scmp.lt.s32.totalorder %s1664_s25, %s2062_s3 }
  0x2c   : > { %585 = vmatpush.bf16.msra.mxu0 %v1293_v1  ;;  %1490 = vmatpush.bf16.msra.mxu1 %v1293_v1  ;;  %v1271_v10 = vld [vmem:[%s1873_s7 + $0x80] sm:$0xff]  ;;  %v1272_v14 = vld [vmem:[%s1873_s7 + $0x88] sm:$0xff]  ;;  %v1273_v18 = vld [vmem:[%s1873_s7 + $0x90] sm:$0xff]  ;;  %p1666_p1 = scmp.ne.s32.totalorder %s1664_s25, %s1665_s26  ;;  %p1671_p12 = scmp.lt.s32.totalorder %s1669_s21, %s1665_s26 }
  0x2d   : > { %1491 = vmatpush.bf16.msra.mxu2 %v1293_v1  ;;  %1492 = vmatpush.bf16.msra.mxu3 %v1293_v1  ;;  %v1279_v11 = vld [vmem:[%s1873_s7 + $0xc0] sm:$0xff]  ;;  %v1280_v15 = vld [vmem:[%s1873_s7 + $0xc8] sm:$0xff]  ;;  %v1281_v19 = vld [vmem:[%s1873_s7 + $0xd0] sm:$0xff] }
  0x2e   : > { %v1258_v20 = vld [vmem:[%s1873_s7 + $0x18] sm:$0xff]  ;;  %v1259_v24 = vld [vmem:[%s1873_s7 + $0x20] sm:$0xff]  ;;  %v1260_v28 = vld [vmem:[%s1873_s7 + $0x28] sm:$0xff]  ;;  %p1667_p4 = pnand %p1666_p1, %p1844_p5  ;;  %p1672_p13 = por %p1671_p12, %p1670_p10 }
  0x2f   : > { %v1266_v21 = vld [vmem:[%s1873_s7 + $0x58] sm:$0xff]  ;;  %v1267_v25 = vld [vmem:[%s1873_s7 + $0x60] sm:$0xff]  ;;  %v1268_v29 = vld [vmem:[%s1873_s7 + $0x68] sm:$0xff] }
  0x30   : > { %586 = vmatpush.bf16.msra.mxu0 %v1292_v2  ;;  %1493 = vmatpush.bf16.msra.mxu1 %v1292_v2  ;;  %v1274_v22 = vld [vmem:[%s1873_s7 + $0x98] sm:$0xff]  ;;  %v1275_v26 = vld [vmem:[%s1873_s7 + $0xa0] sm:$0xff]  ;;  %v1276_v30 = vld [vmem:[%s1873_s7 + $0xa8] sm:$0xff]  ;;  %p1668_p8 = pneg %p1667_p4 }
  0x31   : > { %1494 = vmatpush.bf16.msra.mxu2 %v1292_v2  ;;  %1495 = vmatpush.bf16.msra.mxu3 %v1292_v2  ;;  %v1282_v23 = vld [vmem:[%s1873_s7 + $0xd8] sm:$0xff]  ;;  %v1283_v27 = vld [vmem:[%s1873_s7 + $0xe0] sm:$0xff]  ;;  %v1284_v31 = vld [vmem:[%s1873_s7 + $0xe8] sm:$0xff] }
  0x32   : > { %v1261_v32 = vld [vmem:[%s1873_s7 + $0x30] sm:$0xff]  ;;  %v1262_v36 = vld [vmem:[%s1873_s7 + $0x38] sm:$0xff]  ;;  %v1918_v42 = vld [vmem:[%s2061_s2] ss:$0 sm:$0xff]  ;;  %p1673_p0 = pnand %p1672_p13, %p1668_p8 }
  0x33   : > { %v1269_v33 = vld [vmem:[%s1873_s7 + $0x70] sm:$0xff]  ;;  %v1270_v37 = vld [vmem:[%s1873_s7 + $0x78] sm:$0xff] }
  0x34   : > { %587 = vmatpush.bf16.msra.mxu0 %v1291_v3  ;;  %1496 = vmatpush.bf16.msra.mxu1 %v1291_v3  ;;  %v1277_v34 = vld [vmem:[%s1873_s7 + $0xb0] sm:$0xff]  ;;  %v1278_v38 = vld [vmem:[%s1873_s7 + $0xb8] sm:$0xff] }
  0x35   : > { %1497 = vmatpush.bf16.msra.mxu2 %v1291_v3  ;;  %1498 = vmatpush.bf16.msra.mxu3 %v1291_v3  ;;  %v1285_v35 = vld [vmem:[%s1873_s7 + $0xf0] sm:$0xff]  ;;  %v1286_v39 = vld [vmem:[%s1873_s7 + $0xf8] sm:$0xff] }
  0x38   : > { %588 = vmatpush.bf16.msra.mxu0 %v1290_v4  ;;  %1499 = vmatpush.bf16.msra.mxu1 %v1290_v4 }
  0x39   : > { %1500 = vmatpush.bf16.msra.mxu2 %v1290_v4  ;;  %1501 = vmatpush.bf16.msra.mxu3 %v1290_v4 }
  0x3c   : > { %589 = vmatpush.bf16.msra.mxu0 %v1289_v5  ;;  %1502 = vmatpush.bf16.msra.mxu1 %v1289_v5 }
  0x3d   : > { %1503 = vmatpush.bf16.msra.mxu2 %v1289_v5  ;;  %1504 = vmatpush.bf16.msra.mxu3 %v1289_v5 }
  0x40   : > { %590 = vmatpush.bf16.msra.mxu0 %v1288_v6  ;;  %1505 = vmatpush.bf16.msra.mxu1 %v1288_v6 }
  0x41   : > { %1506 = vmatpush.bf16.msra.mxu2 %v1288_v6  ;;  %1507 = vmatpush.bf16.msra.mxu3 %v1288_v6 }
  0x44   : > { %591 = vmatpush.bf16.msra.mxu0 %v1287_v7  ;;  %1508 = vmatpush.bf16.msra.mxu1 %v1287_v7 }
  0x45   : > { %1509 = vmatpush.bf16.msra.mxu2 %v1287_v7  ;;  %1510 = vmatpush.bf16.msra.mxu3 %v1287_v7 }
  0x47   : > { %592 = vmatmul.bf16.vlgmr.msra.gmra.mxu0 %v1255_v8  ;;  %632 = vmatmul.bf16.vlgmr.msra.gmra.mxu1 %v1263_v9 }
  0x48   : > { %672 = vmatmul.bf16.vlgmr.msra.gmra.mxu2 %v1271_v10  ;;  %712 = vmatmul.bf16.vlgmr.msra.gmra.mxu3 %v1279_v11 }
  0x57   : > { %597 = vmatmul.bf16.gmra.mxu0 %v1256_v12  ;;  %637 = vmatmul.bf16.gmra.mxu1 %v1264_v13 }
  0x58   : > { %677 = vmatmul.bf16.gmra.mxu2 %v1272_v14  ;;  %717 = vmatmul.bf16.gmra.mxu3 %v1280_v15 }
  0x67   : > { %602 = vmatmul.bf16.gmra.mxu0 %v1257_v16  ;;  %642 = vmatmul.bf16.gmra.mxu1 %v1265_v17 }
  0x68   : > { %682 = vmatmul.bf16.gmra.mxu2 %v1273_v18  ;;  %722 = vmatmul.bf16.gmra.mxu3 %v1281_v19 }
  0x77   : > { %607 = vmatmul.bf16.gmra.mxu0 %v1258_v20  ;;  %647 = vmatmul.bf16.gmra.mxu1 %v1266_v21 }
  0x78   : > { %687 = vmatmul.bf16.gmra.mxu2 %v1274_v22  ;;  %727 = vmatmul.bf16.gmra.mxu3 %v1282_v23 }
  0x87   : > { %612 = vmatmul.bf16.gmra.mxu0 %v1259_v24  ;;  %652 = vmatmul.bf16.gmra.mxu1 %v1267_v25 }
  0x88   : > { %692 = vmatmul.bf16.gmra.mxu2 %v1275_v26  ;;  %732 = vmatmul.bf16.gmra.mxu3 %v1283_v27 }
  0x97   : > { %617 = vmatmul.bf16.gmra.mxu0 %v1260_v28  ;;  %657 = vmatmul.bf16.gmra.mxu1 %v1268_v29 }
  0x98   : > { %697 = vmatmul.bf16.gmra.mxu2 %v1276_v30  ;;  %737 = vmatmul.bf16.gmra.mxu3 %v1284_v31 }
  0xa7   : > { %622 = vmatmul.bf16.gmra.mxu0 %v1261_v32  ;;  %662 = vmatmul.bf16.gmra.mxu1 %v1269_v33 }
  0xa8   : > { %702 = vmatmul.bf16.gmra.mxu2 %v1277_v34  ;;  %742 = vmatmul.bf16.gmra.mxu3 %v1285_v35 }
  0xb7   : > { %627 = vmatmul.bf16.gmra.mxu0 %v1262_v36  ;;  %667 = vmatmul.bf16.gmra.mxu1 %v1270_v37 }
  0xb8   : > { %707 = vmatmul.bf16.gmra.mxu2 %v1278_v38  ;;  %747 = vmatmul.bf16.gmra.mxu3 %v1286_v39 }
  0xc4   : > { %v593_v40 = vpop.f32.mrf.mxu0  ;;  %v633_v41 = vpop.f32.mrf.mxu1 }
  0xc5   : > { %v594_v43 = vadd.f32 %v1918_v42, %v593_v40  ;;  %v634_v44 = vadd.f32 %v1918_v42, %v633_v41 }
  0xc7   : > { %v753_v51 = vmax.f32 %v594_v43, 0.0  ;;  %v769_v52 = vmax.f32 %v634_v44, 0.0 }
  0xcb   : > { %v673_v45 = vpop.f32.mrf.mxu2  ;;  %v713_v46 = vpop.f32.mrf.mxu3 }
  0xcc   : > { %v595_v47 = vpop.f32.mrf.mxu0  ;;  %v635_v48 = vpop.f32.mrf.mxu1  ;;  %v674_v57 = vadd.f32 %v1918_v42, %v673_v45  ;;  %v714_v58 = vadd.f32 %v1918_v42, %v713_v46 }
  0xcd   : > { %v596_v49 = vadd.f32 %v1918_v42, %v595_v47  ;;  %v636_v50 = vadd.f32 %v1918_v42, %v635_v48 }
  0xce   : > { %v785_v1 = vmax.f32 %v674_v57, 0.0  ;;  %v801_v2 = vmax.f32 %v714_v58, 0.0 }
  0xcf   : > { %v754_v53 = vmax.f32 %v596_v49, 0.0  ;;  %v770_v54 = vmax.f32 %v636_v50, 0.0 }
  0xd1   : > { %v1299_v55 = vpack.c.bf16 %v754_v53, %v753_v51  ;;  %v1339_v56 = vpack.c.bf16 %v770_v54, %v769_v52 }
  0xd3   : > { %1300 = vst [vmem:[%s1928_s22] sm:$0xff] %v1299_v55   ;;  %v675_v59 = vpop.f32.mrf.mxu2  ;;  %v715_v60 = vpop.f32.mrf.mxu3 }
  0xd4   : > { %1463 = vst [vmem:[%s1928_s22 + $0x40] sm:$0xff] %v1339_v56   ;;  %v676_v61 = vadd.f32 %v1918_v42, %v675_v59  ;;  %v716_v62 = vadd.f32 %v1918_v42, %v715_v60  ;;  %v598_v63 = vpop.f32.mrf.mxu0  ;;  %v638_v0 = vpop.f32.mrf.mxu1 }
  0xd5   : > { %v599_v7 = vadd.f32 %v1918_v42, %v598_v63  ;;  %v639_v8 = vadd.f32 %v1918_v42, %v638_v0 }
  0xd6   : > { %v786_v3 = vmax.f32 %v676_v61, 0.0  ;;  %v802_v4 = vmax.f32 %v716_v62, 0.0 }
  0xd7   : > { %v755_v15 = vmax.f32 %v599_v7, 0.0  ;;  %v771_v16 = vmax.f32 %v639_v8, 0.0 }
  0xd8   : > { %v1379_v5 = vpack.c.bf16 %v786_v3, %v785_v1  ;;  %v1419_v6 = vpack.c.bf16 %v802_v4, %v801_v2 }
  0xda   : > { %1471 = vst [vmem:[%s1928_s22 + $0x80] sm:$0xff] %v1379_v5  }
  0xdb   : > { %1479 = vst [vmem:[%s1928_s22 + $0xc0] sm:$0xff] %v1419_v6   ;;  %v678_v9 = vpop.f32.mrf.mxu2  ;;  %v718_v10 = vpop.f32.mrf.mxu3 }
  0xdc   : > { %v600_v11 = vpop.f32.mrf.mxu0  ;;  %v640_v12 = vpop.f32.mrf.mxu1  ;;  %v679_v21 = vadd.f32 %v1918_v42, %v678_v9  ;;  %v719_v22 = vadd.f32 %v1918_v42, %v718_v10 }
  0xdd   : > { %v601_v13 = vadd.f32 %v1918_v42, %v600_v11  ;;  %v641_v14 = vadd.f32 %v1918_v42, %v640_v12 }
  0xde   : > { %v787_v29 = vmax.f32 %v679_v21, 0.0  ;;  %v803_v30 = vmax.f32 %v719_v22, 0.0 }
  0xdf   : > { %v756_v17 = vmax.f32 %v601_v13, 0.0  ;;  %v772_v18 = vmax.f32 %v641_v14, 0.0 }
  0xe1   : > { %v1304_v19 = vpack.c.bf16 %v756_v17, %v755_v15  ;;  %v1344_v20 = vpack.c.bf16 %v772_v18, %v771_v16 }
  0xe3   : > { %1456 = vst [vmem:[%s1928_s22 + $0x8] sm:$0xff] %v1304_v19   ;;  %v680_v23 = vpop.f32.mrf.mxu2  ;;  %v720_v24 = vpop.f32.mrf.mxu3 }
  0xe4   : > { %1464 = vst [vmem:[%s1928_s22 + $0x48] sm:$0xff] %v1344_v20   ;;  %v681_v25 = vadd.f32 %v1918_v42, %v680_v23  ;;  %v721_v26 = vadd.f32 %v1918_v42, %v720_v24  ;;  %v603_v27 = vpop.f32.mrf.mxu0  ;;  %v643_v28 = vpop.f32.mrf.mxu1 }
  0xe5   : > { %v604_v35 = vadd.f32 %v1918_v42, %v603_v27  ;;  %v644_v36 = vadd.f32 %v1918_v42, %v643_v28 }
  0xe6   : > { %v788_v31 = vmax.f32 %v681_v25, 0.0  ;;  %v804_v32 = vmax.f32 %v721_v26, 0.0 }
  0xe7   : > { %v757_v44 = vmax.f32 %v604_v35, 0.0  ;;  %v773_v45 = vmax.f32 %v644_v36, 0.0 }
  0xe8   : > { %v1384_v33 = vpack.c.bf16 %v788_v31, %v787_v29  ;;  %v1424_v34 = vpack.c.bf16 %v804_v32, %v803_v30 }
  0xea   : > { %1472 = vst [vmem:[%s1928_s22 + $0x88] sm:$0xff] %v1384_v33  }
  0xeb   : > { %1480 = vst [vmem:[%s1928_s22 + $0xc8] sm:$0xff] %v1424_v34   ;;  %v683_v37 = vpop.f32.mrf.mxu2  ;;  %v723_v38 = vpop.f32.mrf.mxu3 }
  0xec   : > { %v605_v39 = vpop.f32.mrf.mxu0  ;;  %v645_v40 = vpop.f32.mrf.mxu1  ;;  %v684_v50 = vadd.f32 %v1918_v42, %v683_v37  ;;  %v724_v51 = vadd.f32 %v1918_v42, %v723_v38 }
  0xed   : > { %v606_v41 = vadd.f32 %v1918_v42, %v605_v39  ;;  %v646_v43 = vadd.f32 %v1918_v42, %v645_v40 }
  0xee   : > { %v789_v58 = vmax.f32 %v684_v50, 0.0  ;;  %v805_v59 = vmax.f32 %v724_v51, 0.0 }
  0xef   : > { %v758_v46 = vmax.f32 %v606_v41, 0.0  ;;  %v774_v47 = vmax.f32 %v646_v43, 0.0 }
  0xf1   : > { %v1309_v48 = vpack.c.bf16 %v758_v46, %v757_v44  ;;  %v1349_v49 = vpack.c.bf16 %v774_v47, %v773_v45 }
  0xf3   : > { %1457 = vst [vmem:[%s1928_s22 + $0x10] sm:$0xff] %v1309_v48   ;;  %v685_v52 = vpop.f32.mrf.mxu2  ;;  %v725_v53 = vpop.f32.mrf.mxu3 }
  0xf4   : > { %1465 = vst [vmem:[%s1928_s22 + $0x50] sm:$0xff] %v1349_v49   ;;  %v686_v54 = vadd.f32 %v1918_v42, %v685_v52  ;;  %v726_v55 = vadd.f32 %v1918_v42, %v725_v53  ;;  %v608_v56 = vpop.f32.mrf.mxu0  ;;  %v648_v57 = vpop.f32.mrf.mxu1 }
  0xf5   : > { %v609_v0 = vadd.f32 %v1918_v42, %v608_v56  ;;  %v649_v1 = vadd.f32 %v1918_v42, %v648_v57 }
  0xf6   : > { %v790_v60 = vmax.f32 %v686_v54, 0.0  ;;  %v806_v61 = vmax.f32 %v726_v55, 0.0 }
  0xf7   : > { %v759_v8 = vmax.f32 %v609_v0, 0.0  ;;  %v775_v9 = vmax.f32 %v649_v1, 0.0 }
  0xf8   : > { %v1389_v62 = vpack.c.bf16 %v790_v60, %v789_v58  ;;  %v1429_v63 = vpack.c.bf16 %v806_v61, %v805_v59 }
  0xfa   : > { %1473 = vst [vmem:[%s1928_s22 + $0x90] sm:$0xff] %v1389_v62  }
  0xfb   : > { %1481 = vst [vmem:[%s1928_s22 + $0xd0] sm:$0xff] %v1429_v63   ;;  %v688_v2 = vpop.f32.mrf.mxu2  ;;  %v728_v3 = vpop.f32.mrf.mxu3 }
  0xfc   : > { %v610_v4 = vpop.f32.mrf.mxu0  ;;  %v650_v5 = vpop.f32.mrf.mxu1  ;;  %v689_v14 = vadd.f32 %v1918_v42, %v688_v2  ;;  %v729_v15 = vadd.f32 %v1918_v42, %v728_v3 }
  0xfd   : > { %v611_v6 = vadd.f32 %v1918_v42, %v610_v4  ;;  %v651_v7 = vadd.f32 %v1918_v42, %v650_v5 }
  0xfe   : > { %v791_v22 = vmax.f32 %v689_v14, 0.0  ;;  %v807_v23 = vmax.f32 %v729_v15, 0.0 }
  0xff   : > { %v760_v10 = vmax.f32 %v611_v6, 0.0  ;;  %v776_v11 = vmax.f32 %v651_v7, 0.0 }
 0x101   : > { %v1314_v12 = vpack.c.bf16 %v760_v10, %v759_v8  ;;  %v1354_v13 = vpack.c.bf16 %v776_v11, %v775_v9 }
 0x103   : > { %1458 = vst [vmem:[%s1928_s22 + $0x18] sm:$0xff] %v1314_v12   ;;  %v690_v16 = vpop.f32.mrf.mxu2  ;;  %v730_v17 = vpop.f32.mrf.mxu3 }
 0x104   : > { %1466 = vst [vmem:[%s1928_s22 + $0x58] sm:$0xff] %v1354_v13   ;;  %v691_v18 = vadd.f32 %v1918_v42, %v690_v16  ;;  %v731_v19 = vadd.f32 %v1918_v42, %v730_v17  ;;  %v613_v20 = vpop.f32.mrf.mxu0  ;;  %v653_v21 = vpop.f32.mrf.mxu1 }
 0x105   : > { %v614_v28 = vadd.f32 %v1918_v42, %v613_v20  ;;  %v654_v29 = vadd.f32 %v1918_v42, %v653_v21 }
 0x106   : > { %v792_v24 = vmax.f32 %v691_v18, 0.0  ;;  %v808_v25 = vmax.f32 %v731_v19, 0.0 }
 0x107   : > { %v761_v36 = vmax.f32 %v614_v28, 0.0  ;;  %v777_v37 = vmax.f32 %v654_v29, 0.0 }
 0x108   : > { %v1394_v26 = vpack.c.bf16 %v792_v24, %v791_v22  ;;  %v1434_v27 = vpack.c.bf16 %v808_v25, %v807_v23 }
 0x10a   : > { %1474 = vst [vmem:[%s1928_s22 + $0x98] sm:$0xff] %v1394_v26  }
 0x10b   : > { %1482 = vst [vmem:[%s1928_s22 + $0xd8] sm:$0xff] %v1434_v27   ;;  %v693_v30 = vpop.f32.mrf.mxu2  ;;  %v733_v31 = vpop.f32.mrf.mxu3 }
 0x10c   : > { %v615_v32 = vpop.f32.mrf.mxu0  ;;  %v655_v33 = vpop.f32.mrf.mxu1  ;;  %v694_v43 = vadd.f32 %v1918_v42, %v693_v30  ;;  %v734_v44 = vadd.f32 %v1918_v42, %v733_v31 }
 0x10d   : > { %v616_v34 = vadd.f32 %v1918_v42, %v615_v32  ;;  %v656_v35 = vadd.f32 %v1918_v42, %v655_v33 }
 0x10e   : > { %v793_v51 = vmax.f32 %v694_v43, 0.0  ;;  %v809_v52 = vmax.f32 %v734_v44, 0.0 }
 0x10f   : > { %v762_v38 = vmax.f32 %v616_v34, 0.0  ;;  %v778_v39 = vmax.f32 %v656_v35, 0.0 }
 0x111   : > { %v1319_v40 = vpack.c.bf16 %v762_v38, %v761_v36  ;;  %v1359_v41 = vpack.c.bf16 %v778_v39, %v777_v37 }
 0x113   : > { %1459 = vst [vmem:[%s1928_s22 + $0x20] sm:$0xff] %v1319_v40   ;;  %v695_v45 = vpop.f32.mrf.mxu2  ;;  %v735_v46 = vpop.f32.mrf.mxu3 }
 0x114   : > { %1467 = vst [vmem:[%s1928_s22 + $0x60] sm:$0xff] %v1359_v41   ;;  %v696_v47 = vadd.f32 %v1918_v42, %v695_v45  ;;  %v736_v48 = vadd.f32 %v1918_v42, %v735_v46  ;;  %v618_v49 = vpop.f32.mrf.mxu0  ;;  %v658_v50 = vpop.f32.mrf.mxu1 }
 0x115   : > { %v619_v57 = vadd.f32 %v1918_v42, %v618_v49  ;;  %v659_v58 = vadd.f32 %v1918_v42, %v658_v50 }
 0x116   : > { %v794_v53 = vmax.f32 %v696_v47, 0.0  ;;  %v810_v54 = vmax.f32 %v736_v48, 0.0 }
 0x117   : > { %v763_v1 = vmax.f32 %v619_v57, 0.0  ;;  %v779_v2 = vmax.f32 %v659_v58, 0.0 }
 0x118   : > { %v1399_v55 = vpack.c.bf16 %v794_v53, %v793_v51  ;;  %v1439_v56 = vpack.c.bf16 %v810_v54, %v809_v52 }
 0x11a   : > { %1475 = vst [vmem:[%s1928_s22 + $0xa0] sm:$0xff] %v1399_v55  }
 0x11b   : > { %1483 = vst [vmem:[%s1928_s22 + $0xe0] sm:$0xff] %v1439_v56   ;;  %v698_v59 = vpop.f32.mrf.mxu2  ;;  %v738_v60 = vpop.f32.mrf.mxu3 }
 0x11c   : > { %v620_v61 = vpop.f32.mrf.mxu0  ;;  %v660_v62 = vpop.f32.mrf.mxu1  ;;  %v699_v7 = vadd.f32 %v1918_v42, %v698_v59  ;;  %v739_v8 = vadd.f32 %v1918_v42, %v738_v60 }
 0x11d   : > { %v621_v63 = vadd.f32 %v1918_v42, %v620_v61  ;;  %v661_v0 = vadd.f32 %v1918_v42, %v660_v62 }
 0x11e   : > { %v795_v15 = vmax.f32 %v699_v7, 0.0  ;;  %v811_v16 = vmax.f32 %v739_v8, 0.0 }
 0x11f   : > { %v764_v3 = vmax.f32 %v621_v63, 0.0  ;;  %v780_v4 = vmax.f32 %v661_v0, 0.0 }
 0x121   : > { %v1324_v5 = vpack.c.bf16 %v764_v3, %v763_v1  ;;  %v1364_v6 = vpack.c.bf16 %v780_v4, %v779_v2 }
 0x123   : > { %1460 = vst [vmem:[%s1928_s22 + $0x28] sm:$0xff] %v1324_v5   ;;  %v700_v9 = vpop.f32.mrf.mxu2  ;;  %v740_v10 = vpop.f32.mrf.mxu3 }
 0x124   : > { %1468 = vst [vmem:[%s1928_s22 + $0x68] sm:$0xff] %v1364_v6   ;;  %v701_v11 = vadd.f32 %v1918_v42, %v700_v9  ;;  %v741_v12 = vadd.f32 %v1918_v42, %v740_v10  ;;  %v623_v13 = vpop.f32.mrf.mxu0  ;;  %v663_v14 = vpop.f32.mrf.mxu1 }
 0x125   : > { %v624_v21 = vadd.f32 %v1918_v42, %v623_v13  ;;  %v664_v22 = vadd.f32 %v1918_v42, %v663_v14 }
 0x126   : > { %v796_v17 = vmax.f32 %v701_v11, 0.0  ;;  %v812_v18 = vmax.f32 %v741_v12, 0.0 }
 0x127   : > { %v765_v29 = vmax.f32 %v624_v21, 0.0  ;;  %v781_v30 = vmax.f32 %v664_v22, 0.0 }
 0x128   : > { %v1404_v19 = vpack.c.bf16 %v796_v17, %v795_v15  ;;  %v1444_v20 = vpack.c.bf16 %v812_v18, %v811_v16 }
 0x12a   : > { %1476 = vst [vmem:[%s1928_s22 + $0xa8] sm:$0xff] %v1404_v19  }
 0x12b   : > { %1484 = vst [vmem:[%s1928_s22 + $0xe8] sm:$0xff] %v1444_v20   ;;  %v703_v23 = vpop.f32.mrf.mxu2  ;;  %v743_v24 = vpop.f32.mrf.mxu3 }
 0x12c   : > { %v625_v25 = vpop.f32.mrf.mxu0  ;;  %v665_v26 = vpop.f32.mrf.mxu1  ;;  %v704_v35 = vadd.f32 %v1918_v42, %v703_v23  ;;  %v744_v36 = vadd.f32 %v1918_v42, %v743_v24 }
 0x12d   : > { %v626_v27 = vadd.f32 %v1918_v42, %v625_v25  ;;  %v666_v28 = vadd.f32 %v1918_v42, %v665_v26 }
 0x12e   : > { %v797_v44 = vmax.f32 %v704_v35, 0.0  ;;  %v813_v45 = vmax.f32 %v744_v36, 0.0 }
 0x12f   : > { %v766_v31 = vmax.f32 %v626_v27, 0.0  ;;  %v782_v32 = vmax.f32 %v666_v28, 0.0 }
 0x131   : > { %v1329_v33 = vpack.c.bf16 %v766_v31, %v765_v29  ;;  %v1369_v34 = vpack.c.bf16 %v782_v32, %v781_v30 }
 0x133   : > { %1461 = vst [vmem:[%s1928_s22 + $0x30] sm:$0xff] %v1329_v33   ;;  %v705_v37 = vpop.f32.mrf.mxu2  ;;  %v745_v38 = vpop.f32.mrf.mxu3 }
 0x134   : > { %1469 = vst [vmem:[%s1928_s22 + $0x70] sm:$0xff] %v1369_v34   ;;  %v706_v39 = vadd.f32 %v1918_v42, %v705_v37  ;;  %v746_v40 = vadd.f32 %v1918_v42, %v745_v38  ;;  %v628_v41 = vpop.f32.mrf.mxu0  ;;  %v668_v43 = vpop.f32.mrf.mxu1 }
 0x135   : > { %v629_v50 = vadd.f32 %v1918_v42, %v628_v41  ;;  %v669_v51 = vadd.f32 %v1918_v42, %v668_v43 }
 0x136   : > { %v798_v46 = vmax.f32 %v706_v39, 0.0  ;;  %v814_v47 = vmax.f32 %v746_v40, 0.0 }
 0x137   : > { %v767_v58 = vmax.f32 %v629_v50, 0.0  ;;  %v783_v59 = vmax.f32 %v669_v51, 0.0 }
 0x138   : > { %v1409_v48 = vpack.c.bf16 %v798_v46, %v797_v44  ;;  %v1449_v49 = vpack.c.bf16 %v814_v47, %v813_v45 }
 0x13a   : > { %1477 = vst [vmem:[%s1928_s22 + $0xb0] sm:$0xff] %v1409_v48  }
 0x13b   : > { %1485 = vst [vmem:[%s1928_s22 + $0xf0] sm:$0xff] %v1449_v49   ;;  %v708_v52 = vpop.f32.mrf.mxu2  ;;  %v748_v53 = vpop.f32.mrf.mxu3 }
 0x13c   : > { %v630_v54 = vpop.f32.mrf.mxu0  ;;  %v670_v55 = vpop.f32.mrf.mxu1  ;;  %v709_v0 = vadd.f32 %v1918_v42, %v708_v52  ;;  %v749_v1 = vadd.f32 %v1918_v42, %v748_v53 }
 0x13d   : > { %v631_v56 = vadd.f32 %v1918_v42, %v630_v54  ;;  %v671_v57 = vadd.f32 %v1918_v42, %v670_v55 }
 0x13e   : > { %v799_v6 = vmax.f32 %v709_v0, 0.0  ;;  %v815_v7 = vmax.f32 %v749_v1, 0.0 }
 0x13f   : > { %v768_v60 = vmax.f32 %v631_v56, 0.0  ;;  %v784_v61 = vmax.f32 %v671_v57, 0.0 }
 0x141   : > { %v1334_v62 = vpack.c.bf16 %v768_v60, %v767_v58  ;;  %v1374_v63 = vpack.c.bf16 %v784_v61, %v783_v59 }
 0x143   : > { %1462 = vst [vmem:[%s1928_s22 + $0x38] sm:$0xff] %v1334_v62   ;;  %v710_v2 = vpop.f32.mrf.mxu2  ;;  %v750_v3 = vpop.f32.mrf.mxu3 }
 0x144   : > { %1470 = vst [vmem:[%s1928_s22 + $0x78] sm:$0xff] %v1374_v63   ;;  %v711_v4 = vadd.f32 %v1918_v42, %v710_v2  ;;  %v751_v5 = vadd.f32 %v1918_v42, %v750_v3 }
 0x146   : > { %v800_v8 = vmax.f32 %v711_v4, 0.0  ;;  %v816_v9 = vmax.f32 %v751_v5, 0.0 }
 0x148   : > { %v1414_v10 = vpack.c.bf16 %v800_v8, %v799_v6  ;;  %v1454_v11 = vpack.c.bf16 %v816_v9, %v815_v7 }
 0x14a   : > { %1478 = vst [vmem:[%s1928_s22 + $0xb8] sm:$0xff] %v1414_v10  }
 0x14b   : > { %1486 = vst [vmem:[%s1928_s22 + $0xf8] sm:$0xff] %v1454_v11  }
 0x14c   : > { %1676 = shalt.err (!%p1673_p0)
}
 0x14d   : > { %s1740_s6 = smov 64   ;;  %s1741_s7 = smov 4  }
 0x14e   : > { %1517 = dma.vmem_to_hbm [thread:$0]  (%p1844_p5), %s960_s15, 4096, %s962_s19, %s946_s24, %s1740_s6, %s1740_s6, %s1741_s7  }
 0x14f PF: > { %s976_s1 = sand.u32 1, %s1715_s12   ;;  %p1528_p3 = pnand %p1081_p11, %p1811_p6 }
 0x150   : > { %s977_s20 = scalar_lea.sflag [#allocation4], %s976_s1 }
 0x151   : > { %p1529_p7 = pneg %p1528_p3 }
 0x153   : > { %1710 = dma.done.wait (%p1529_p7), %s977_s20, 4096  }
 0x154   : > { %1712 = vsyncadd (%p1529_p7), %s977_s20, 4294963200  ;;  %s20_s17 = sadd.s32 1, %s1735_s17   ;;  %s2074_s12 = smov %s1719_s13 }
 0x155   : > { %p17_p9 = scmp.ge.s32.totalorder %s20_s17, 4   ;;  %s2075_s13 = smov %s1723_s14 }
 0x156   : > { %s2076_s14 = smov %s1853_s18  ;;  %s2077_s15 = smov %s1731_s16 }
 0x157   : > { %s2078_s16 = smov %s2080_s5  ;;  %19 = sbr.rel (!%p17_p9) target bundleno = 9 (0x9), region = 85 }
 0x15c   :  { %983 = vsyncpa [#allocation3], 1 }
 0x15d   :  { %985 = vsyncpa [#allocation3 + $0x1], 1 }
 0x15e   :  { %986 = vsyncpa [#allocation6], 1 }
 0x15f   :  { %987 = vsyncpa [#allocation4], 1 }
 0x160   :  { %989 = vsyncpa [#allocation4 + $0x1], 1 }

</bundles_post_ra>
